<compile_context>
chip_gen: v6e
topology: v6e:2x2x1
jax: 0.10.0
libtpu: 0.0.40
codegen_flags: <defaults>
</compile_context>

<pallas_src>
import jax
import jax.numpy as jnp
from jax.experimental import pallas as pl
from jax.experimental.pallas import tpu as pltpu

_BN_EPS = 1e-5


# --------------------------------------------------------------------------- kernel
def _make_fused_kernel(*, stride, inp, bf, H, W, lane):
    """Build the fused InvertedResidual kernel for static (stride, inp, bf, H, W)."""
    Ho = (H - 1) // stride + 1
    Wo = (W - 1) // stride + 1

    def selection_matrices():
        # R[dy] : (Ho, H)   0/1,  R[dy][i, r] = 1  iff  r == s*i + dy - 1
        # C[dx] : (W, lane) 0/1,  C[dx][c, j] = 1  iff  c == s*j + dx - 1  and j < Wo
        # The "-1" realizes the virtual 1-px zero halo (out-of-range rows/cols have
        # no 1 entry), "s*" realizes the stride subsample, and columns j >= Wo are
        # all-zero so the padded output lanes stay exact zeros.
        oi = jax.lax.broadcasted_iota(jnp.int32, (Ho, H), 0)
        rr = jax.lax.broadcasted_iota(jnp.int32, (Ho, H), 1)
        R = [(rr == stride * oi + (dy - 1)).astype(jnp.float32) for dy in range(3)]
        cc = jax.lax.broadcasted_iota(jnp.int32, (W, lane), 0)
        oj = jax.lax.broadcasted_iota(jnp.int32, (W, lane), 1)
        C = [((cc == stride * oj + (dx - 1)) & (oj < Wo)).astype(jnp.float32)
             for dx in range(3)]
        return R, C

    def pointwise(planes, w_ref, b_ref):
        """1x1 conv + folded BN + ReLU as unrolled VPU scalar-FMAs (SMEM weights).
        Kept scalar because Cin, Cout <= 4 here (see TODO at file top for MXU path)."""
        cin, cout = len(planes), b_ref.shape[0]
        h, w = planes[0].shape
        outs = []
        for co in range(cout):
            acc = jnp.zeros((h, w), jnp.float32) + b_ref[co]
            for ci in range(cin):
                acc = acc + planes[ci] * w_ref[ci, co]
            outs.append(jnp.maximum(acc, 0.0))
        return outs

    def depthwise(planes, wd_ref, bd_ref, R, C):
        """3x3 depthwise conv (padding=1, stride=s) + folded BN bias.

        out[i, j] = bias + sum_{dy,dx} w[dy*3+dx] * x[s*i+dy-1, s*j+dx-1]
                  = bias + sum_dy (R[dy] @ x) @ (sum_dx w[dy*3+dx] * C[dx])

        Two small MXU matmuls per (channel, dy); the accumulator is built directly
        at (Ho, lane): nothing is computed at full resolution and then discarded,
        and there are no misaligned tap slices / relayouts."""
        outs = []
        for ci in range(len(planes)):
            acc = jnp.zeros((Ho, lane), jnp.float32) + bd_ref[ci]
            for dy in range(3):
                if stride == 1 and dy == 1:
                    rsub = planes[ci]                                     # R[1] == I
                else:
                    rsub = jnp.dot(R[dy], planes[ci],
                                   preferred_element_type=jnp.float32)    # (Ho, W)
                cw = (wd_ref[ci, 3 * dy + 0] * C[0]
                      + wd_ref[ci, 3 * dy + 1] * C[1]
                      + wd_ref[ci, 3 * dy + 2] * C[2])                    # (W, lane)
                acc = acc + jnp.dot(rsub, cw,
                                    preferred_element_type=jnp.float32)   # (Ho, lane)
            outs.append(acc)
        return outs

    if stride == 1:
        def kernel(x_ref, w1, b1, wd, bd, w2, b2, o_ref):
            R, C = selection_matrices()
            # branch2 input = second half of the channels
            x2 = [x_ref[0, bf + c].astype(jnp.float32) for c in range(bf)]
            y = pointwise(x2, w1, b1)            # 1x1 + BN + ReLU          (H, W)
            y = depthwise(y, wd, bd, R, C)       # 3x3 dw + BN              (H, lane)
            y = pointwise(y, w2, b2)             # 1x1 + BN + ReLU          (H, lane)
            # concat + channel_shuffle(groups=2) folded into output channel slots:
            #   out[2j]   <- passthrough x[:, j]   (group 0)
            #   out[2j+1] <- branch2 channel j     (group 1), dense 128-lane store
            for j in range(bf):
                o_ref[0, 2 * j, :, :W] = x_ref[0, j].astype(o_ref.dtype)
                o_ref[0, 2 * j + 1] = y[j].astype(o_ref.dtype)
    else:
        def kernel(x_ref, wd1, bd1, wp1, bp1, w1, b1, wd2, bd2, w2, b2, o_ref):
            R, C = selection_matrices()
            xp = [x_ref[0, c].astype(jnp.float32) for c in range(inp)]
            # branch1: dw(s) -> BN -> 1x1 -> BN -> ReLU
            g0 = pointwise(depthwise(xp, wd1, bd1, R, C), wp1, bp1)       # (Ho, lane)
            # branch2: 1x1 -> BN -> ReLU -> dw(s) -> BN -> 1x1 -> BN -> ReLU
            y = pointwise(xp, w1, b1)                                     # (H, W)
            y = depthwise(y, wd2, bd2, R, C)                              # (Ho, lane)
            g1 = pointwise(y, w2, b2)                                     # (Ho, lane)
            # concat + channel_shuffle folded into output channel slots
            for j in range(bf):
                o_ref[0, 2 * j] = g0[j].astype(o_ref.dtype)
                o_ref[0, 2 * j + 1] = g1[j].astype(o_ref.dtype)

    return kernel


# --------------------------------------------------------------------------- BN folding (host-side, weight-only)
def _bn_fold(bn):
    scale = bn["gamma"] / jnp.sqrt(bn["var"] + _BN_EPS)
    shift = bn["beta"] - bn["mean"] * scale
    return scale, shift


def _fold_pw(w_oihw, bn):
    # (Cout, Cin, 1, 1) -> (Cin, Cout), BN scale folded per output channel.
    scale, shift = _bn_fold(bn)
    return w_oihw[:, :, 0, 0].T * scale[None, :], shift


def _fold_dw(w_c1kk, bn):
    # (C, 1, 3, 3) -> (C, 9) [index dy*3+dx], BN scale folded per channel.
    scale, shift = _bn_fold(bn)
    return (w_c1kk[:, 0] * scale[:, None, None]).reshape(w_c1kk.shape[0], 9), shift


# --------------------------------------------------------------------------- module forward (single pallas_call)
def inverted_residual_forward(x_nchw, params, stride):
    """InvertedResidual forward.  x is NCHW; returns NCHW (like the PyTorch module)."""
    N, Cin, H, W = x_nchw.shape
    Ho = (H - 1) // stride + 1
    Wo = (W - 1) // stride + 1
    lane = max(128, pl.cdiv(Wo, 128) * 128)      # lane-dense (>=128) output stores

    if stride == 1:
        bf = Cin // 2
        p2 = params["branch2"]
        w1, b1 = _fold_pw(p2["pw1_w"], p2["bn1"])
        wd, bd = _fold_dw(p2["dw_w"], p2["bn2"])
        w2, b2 = _fold_pw(p2["pw2_w"], p2["bn3"])
        weights = (w1, b1, wd, bd, w2, b2)
    else:
        p1, p2 = params["branch1"], params["branch2"]
        bf = p2["pw2_w"].shape[0]
        wd1, bd1 = _fold_dw(p1["dw_w"], p1["bn1"])
        wp1, bp1 = _fold_pw(p1["pw_w"], p1["bn2"])
        w1, b1 = _fold_pw(p2["pw1_w"], p2["bn1"])
        wd2, bd2 = _fold_dw(p2["dw_w"], p2["bn2"])
        w2, b2 = _fold_pw(p2["pw2_w"], p2["bn3"])
        weights = (wd1, bd1, wp1, bp1, w1, b1, wd2, bd2, w2, b2)

    oup = 2 * bf
    kernel = _make_fused_kernel(stride=stride, inp=Cin, bf=bf, H=H, W=W, lane=lane)
    smem = pl.BlockSpec(memory_space=pltpu.MemorySpace.SMEM)  # folded weights/biases

    out = pl.pallas_call(
        kernel,
        out_shape=jax.ShapeDtypeStruct((N, oup, Ho, lane), x_nchw.dtype),
        grid_spec=pltpu.PrefetchScalarGridSpec(
            num_scalar_prefetch=0,
            grid=(N,),
            in_specs=[pl.BlockSpec((1, Cin, H, W), lambda n: (n, 0, 0, 0))]
            + [smem] * len(weights),
            out_specs=pl.BlockSpec((1, oup, Ho, lane), lambda n: (n, 0, 0, 0)),
        ),
        compiler_params=pltpu.CompilerParams(dimension_semantics=("parallel",)),
    )(x_nchw, *weights)
    # Crop the lane padding that was added only to get dense 128-lane stores.
    return out[..., :Wo]


# --------------------------------------------------------------------------- deterministic params
def _init_bn(key, c):
    k1, k2, k3, k4 = jax.random.split(key, 4)
    return {
        "gamma": jax.random.uniform(k1, (c,), jnp.float32, 0.5, 1.5),
        "beta": 0.1 * jax.random.normal(k2, (c,), jnp.float32),
        "mean": 0.1 * jax.random.normal(k3, (c,), jnp.float32),
        "var": jax.random.uniform(k4, (c,), jnp.float32, 0.5, 1.5),
    }


def init_params(inp, oup, stride, key):
    bf = oup // 2
    bf_in = inp if stride > 1 else bf
    keys = iter(jax.random.split(key, 16))
    params = {}
    if stride > 1:
        params["branch1"] = {
            "dw_w": 0.3 * jax.random.normal(next(keys), (inp, 1, 3, 3), jnp.float32),
            "bn1": _init_bn(next(keys), inp),
            "pw_w": 0.3 * jax.random.normal(next(keys), (bf, inp, 1, 1), jnp.float32),
            "bn2": _init_bn(next(keys), bf),
        }
    params["branch2"] = {
        "pw1_w": 0.3 * jax.random.normal(next(keys), (bf, bf_in, 1, 1), jnp.float32),
        "bn1": _init_bn(next(keys), bf),
        "dw_w": 0.3 * jax.random.normal(next(keys), (bf, 1, 3, 3), jnp.float32),
        "bn2": _init_bn(next(keys), bf),
        "pw2_w": 0.3 * jax.random.normal(next(keys), (bf, bf, 1, 1), jnp.float32),
        "bn3": _init_bn(next(keys), bf),
    }
    return params


# --------------------------------------------------------------------------- pure-JAX reference (NCHW)
def _conv_ref(x, w, stride, padding, groups):
    return jax.lax.conv_general_dilated(
        x, w, (stride, stride), [(padding, padding)] * 2,
        feature_group_count=groups,
        dimension_numbers=("NCHW", "OIHW", "NCHW"),
        precision=jax.lax.Precision.HIGHEST)


def _bn_ref(x, bn):
    g, b, m, v = (bn["gamma"], bn["beta"], bn["mean"], bn["var"])
    inv = g / jnp.sqrt(v + _BN_EPS)
    return (x - m[None, :, None, None]) * inv[None, :, None, None] + b[None, :, None, None]


def _branch1_ref(x, p, stride):
    y = _conv_ref(x, p["dw_w"], stride, 1, x.shape[1])
    y = _bn_ref(y, p["bn1"])
    y = _conv_ref(y, p["pw_w"], 1, 0, 1)
    return jnp.maximum(_bn_ref(y, p["bn2"]), 0.0)


def _branch2_ref(x, p, stride):
    y = _conv_ref(x, p["pw1_w"], 1, 0, 1)
    y = jnp.maximum(_bn_ref(y, p["bn1"]), 0.0)
    y = _conv_ref(y, p["dw_w"], stride, 1, y.shape[1])
    y = _bn_ref(y, p["bn2"])
    y = _conv_ref(y, p["pw2_w"], 1, 0, 1)
    return jnp.maximum(_bn_ref(y, p["bn3"]), 0.0)


def inverted_residual_ref(x, params, stride):
    if stride == 1:
        c = x.shape[1] // 2
        x1, x2 = x[:, :c], x[:, c:]
        out = jnp.concatenate([x1, _branch2_ref(x2, params["branch2"], stride)], axis=1)
    else:
        out = jnp.concatenate(
            [_branch1_ref(x, params["branch1"], stride),
             _branch2_ref(x, params["branch2"], stride)], axis=1)
    b, c, h, w = out.shape
    out = out.reshape(b, 2, c // 2, h, w)
    out = jnp.transpose(out, (0, 2, 1, 3, 4))
    return out.reshape(b, c, h, w)


# --------------------------------------------------------------------------- main
if __name__ == "__main__":
    key = jax.random.PRNGKey(0)
    kx, kp1, kp2 = jax.random.split(key, 3)
    x = jax.random.normal(kx, (2, 4, 16, 16), jnp.float32)  # NCHW, like PyTorch

    # Tolerance: in-kernel depthwise taps go through the MXU (f32 multi-pass), which
    # need not be bit-identical to the HIGHEST-precision XLA reference convolutions.
    TOL = dict(atol=5e-3, rtol=5e-3)

    # stride=1 (requires inp == oup): InvertedResidual(4, 4, 1)
    params1 = init_params(4, 4, 1, kp1)
    out1 = jax.block_until_ready(inverted_residual_forward(x, params1, 1))
    ref1 = inverted_residual_ref(x, params1, 1)
    assert out1.shape == (2, 4, 16, 16)
    assert jnp.allclose(out1, ref1, **TOL), "stride=1 mismatch"

    # stride=2 (downsampling block): InvertedResidual(4, 8, 2)
    params2 = init_params(4, 8, 2, kp2)
    out2 = jax.block_until_ready(inverted_residual_forward(x, params2, 2))
    ref2 = inverted_residual_ref(x, params2, 2)
    assert out2.shape == (2, 8, 8, 8)
    assert jnp.allclose(out2, ref2, **TOL), "stride=2 mismatch"

    print("KERNEL_OK")
</pallas_src>

<mosaic_0001>
module attributes {stable_mosaic.version = 11 : i64} {
  func.func @kernel(%arg0: i32, %arg1: memref<1x4x16x16xf32, #tpu.memory_space<vmem>>, %arg2: memref<2x2xf32, #tpu.memory_space<smem>>, %arg3: memref<2xf32, #tpu.memory_space<smem>>, %arg4: memref<2x9xf32, #tpu.memory_space<smem>>, %arg5: memref<2xf32, #tpu.memory_space<smem>>, %arg6: memref<2x2xf32, #tpu.memory_space<smem>>, %arg7: memref<2xf32, #tpu.memory_space<smem>>, %arg8: memref<1x4x16x128xf32, #tpu.memory_space<vmem>>) attributes {dimension_semantics = [#tpu.dimension_semantics<parallel>], iteration_bounds = array<i64: 2>, scalar_prefetch = 0 : i64, scratch_operands = 0 : i64, tpu.core_type = #tpu.core_type<tc>, window_params = [{transform_indices = @transform_0, window_bounds = array<i64: 1, 4, 16, 16>}, {transform_indices = @transform_1, window_bounds = array<i64: 2, 2>}, {transform_indices = @transform_2, window_bounds = array<i64: 2>}, {transform_indices = @transform_3, window_bounds = array<i64: 2, 9>}, {transform_indices = @transform_4, window_bounds = array<i64: 2>}, {transform_indices = @transform_5, window_bounds = array<i64: 2, 2>}, {transform_indices = @transform_6, window_bounds = array<i64: 2>}, {transform_indices = @transform_7, window_bounds = array<i64: 1, 4, 16, 128>}]} {
    %0 = tpu.iota {dimensions = array<i32: 0>} : vector<16x16xi32>
    %1 = tpu.iota {dimensions = array<i32: 1>} : vector<16x16xi32>
    %c1_i32 = arith.constant 1 : i32
    %2 = vector.broadcast %c1_i32 : i32 to vector<16x16xi32>
    %3 = arith.muli %2, %0 : vector<16x16xi32>
    %c-1_i32 = arith.constant -1 : i32
    %4 = vector.broadcast %c-1_i32 : i32 to vector<16x16xi32>
    %5 = arith.addi %3, %4 : vector<16x16xi32>
    %6 = arith.cmpi eq, %1, %5 : vector<16x16xi32>
    %7 = arith.extui %6 : vector<16x16xi1> to vector<16x16xi32>
    %8 = arith.sitofp %7 : vector<16x16xi32> to vector<16x16xf32>
    %c1_i32_0 = arith.constant 1 : i32
    %9 = vector.broadcast %c1_i32_0 : i32 to vector<16x16xi32>
    %10 = arith.muli %9, %0 : vector<16x16xi32>
    %c1_i32_1 = arith.constant 1 : i32
    %11 = vector.broadcast %c1_i32_1 : i32 to vector<16x16xi32>
    %12 = arith.addi %10, %11 : vector<16x16xi32>
    %13 = arith.cmpi eq, %1, %12 : vector<16x16xi32>
    %14 = arith.extui %13 : vector<16x16xi1> to vector<16x16xi32>
    %15 = arith.sitofp %14 : vector<16x16xi32> to vector<16x16xf32>
    %16 = tpu.iota {dimensions = array<i32: 0>} : vector<16x128xi32>
    %17 = tpu.iota {dimensions = array<i32: 1>} : vector<16x128xi32>
    %c1_i32_2 = arith.constant 1 : i32
    %18 = vector.broadcast %c1_i32_2 : i32 to vector<16x128xi32>
    %19 = arith.muli %18, %17 : vector<16x128xi32>
    %c-1_i32_3 = arith.constant -1 : i32
    %20 = vector.broadcast %c-1_i32_3 : i32 to vector<16x128xi32>
    %21 = arith.addi %19, %20 : vector<16x128xi32>
    %22 = arith.cmpi eq, %16, %21 : vector<16x128xi32>
    %c16_i32 = arith.constant 16 : i32
    %23 = vector.broadcast %c16_i32 : i32 to vector<16x128xi32>
    %24 = arith.cmpi slt, %17, %23 : vector<16x128xi32>
    %25 = arith.andi %22, %24 : vector<16x128xi1>
    %26 = arith.extui %25 : vector<16x128xi1> to vector<16x128xi32>
    %27 = arith.sitofp %26 : vector<16x128xi32> to vector<16x128xf32>
    %c1_i32_4 = arith.constant 1 : i32
    %28 = vector.broadcast %c1_i32_4 : i32 to vector<16x128xi32>
    %29 = arith.muli %28, %17 : vector<16x128xi32>
    %c0_i32 = arith.constant 0 : i32
    %30 = vector.broadcast %c0_i32 : i32 to vector<16x128xi32>
    %31 = arith.addi %29, %30 : vector<16x128xi32>
    %32 = arith.cmpi eq, %16, %31 : vector<16x128xi32>
    %c16_i32_5 = arith.constant 16 : i32
    %33 = vector.broadcast %c16_i32_5 : i32 to vector<16x128xi32>
    %34 = arith.cmpi slt, %17, %33 : vector<16x128xi32>
    %35 = arith.andi %32, %34 : vector<16x128xi1>
    %36 = arith.extui %35 : vector<16x128xi1> to vector<16x128xi32>
    %37 = arith.sitofp %36 : vector<16x128xi32> to vector<16x128xf32>
    %c1_i32_6 = arith.constant 1 : i32
    %38 = vector.broadcast %c1_i32_6 : i32 to vector<16x128xi32>
    %39 = arith.muli %38, %17 : vector<16x128xi32>
    %c1_i32_7 = arith.constant 1 : i32
    %40 = vector.broadcast %c1_i32_7 : i32 to vector<16x128xi32>
    %41 = arith.addi %39, %40 : vector<16x128xi32>
    %42 = arith.cmpi eq, %16, %41 : vector<16x128xi32>
    %c16_i32_8 = arith.constant 16 : i32
    %43 = vector.broadcast %c16_i32_8 : i32 to vector<16x128xi32>
    %44 = arith.cmpi slt, %17, %43 : vector<16x128xi32>
    %45 = arith.andi %42, %44 : vector<16x128xi1>
    %46 = arith.extui %45 : vector<16x128xi1> to vector<16x128xi32>
    %47 = arith.sitofp %46 : vector<16x128xi32> to vector<16x128xf32>
    %c0 = arith.constant 0 : index
    %c2 = arith.constant 2 : index
    %c0_9 = arith.constant 0 : index
    %c0_10 = arith.constant 0 : index
    %48 = vector.load %arg1[%c0, %c2, %c0_9, %c0_10] : memref<1x4x16x16xf32, #tpu.memory_space<vmem>>, vector<1x1x16x16xf32>
    %49 = vector.shape_cast %48 : vector<1x1x16x16xf32> to vector<16x16xf32>
    %c0_11 = arith.constant 0 : index
    %c3 = arith.constant 3 : index
    %c0_12 = arith.constant 0 : index
    %c0_13 = arith.constant 0 : index
    %50 = vector.load %arg1[%c0_11, %c3, %c0_12, %c0_13] : memref<1x4x16x16xf32, #tpu.memory_space<vmem>>, vector<1x1x16x16xf32>
    %51 = vector.shape_cast %50 : vector<1x1x16x16xf32> to vector<16x16xf32>
    %cst = arith.constant 0.000000e+00 : f32
    %52 = vector.broadcast %cst : f32 to vector<16x16xf32>
    %c0_14 = arith.constant 0 : index
    %53 = memref.load %arg3[%c0_14] : memref<2xf32, #tpu.memory_space<smem>>
    %54 = vector.broadcast %53 : f32 to vector<16x16xf32>
    %55 = arith.addf %52, %54 : vector<16x16xf32>
    %c0_15 = arith.constant 0 : index
    %c0_16 = arith.constant 0 : index
    %56 = memref.load %arg2[%c0_15, %c0_16] : memref<2x2xf32, #tpu.memory_space<smem>>
    %57 = vector.broadcast %56 : f32 to vector<16x16xf32>
    %58 = arith.mulf %49, %57 : vector<16x16xf32>
    %59 = arith.addf %55, %58 : vector<16x16xf32>
    %c1 = arith.constant 1 : index
    %c0_17 = arith.constant 0 : index
    %60 = memref.load %arg2[%c1, %c0_17] : memref<2x2xf32, #tpu.memory_space<smem>>
    %61 = vector.broadcast %60 : f32 to vector<16x16xf32>
    %62 = arith.mulf %51, %61 : vector<16x16xf32>
    %63 = arith.addf %59, %62 : vector<16x16xf32>
    %cst_18 = arith.constant 0.000000e+00 : f32
    %64 = vector.broadcast %cst_18 : f32 to vector<16x16xf32>
    %65 = arith.maximumf %63, %64 : vector<16x16xf32>
    %cst_19 = arith.constant 0.000000e+00 : f32
    %66 = vector.broadcast %cst_19 : f32 to vector<16x16xf32>
    %c1_20 = arith.constant 1 : index
    %67 = memref.load %arg3[%c1_20] : memref<2xf32, #tpu.memory_space<smem>>
    %68 = vector.broadcast %67 : f32 to vector<16x16xf32>
    %69 = arith.addf %66, %68 : vector<16x16xf32>
    %c0_21 = arith.constant 0 : index
    %c1_22 = arith.constant 1 : index
    %70 = memref.load %arg2[%c0_21, %c1_22] : memref<2x2xf32, #tpu.memory_space<smem>>
    %71 = vector.broadcast %70 : f32 to vector<16x16xf32>
    %72 = arith.mulf %49, %71 : vector<16x16xf32>
    %73 = arith.addf %69, %72 : vector<16x16xf32>
    %c1_23 = arith.constant 1 : index
    %c1_24 = arith.constant 1 : index
    %74 = memref.load %arg2[%c1_23, %c1_24] : memref<2x2xf32, #tpu.memory_space<smem>>
    %75 = vector.broadcast %74 : f32 to vector<16x16xf32>
    %76 = arith.mulf %51, %75 : vector<16x16xf32>
    %77 = arith.addf %73, %76 : vector<16x16xf32>
    %cst_25 = arith.constant 0.000000e+00 : f32
    %78 = vector.broadcast %cst_25 : f32 to vector<16x16xf32>
    %79 = arith.maximumf %77, %78 : vector<16x16xf32>
    %cst_26 = arith.constant 0.000000e+00 : f32
    %80 = vector.broadcast %cst_26 : f32 to vector<16x128xf32>
    %c0_27 = arith.constant 0 : index
    %81 = memref.load %arg5[%c0_27] : memref<2xf32, #tpu.memory_space<smem>>
    %82 = vector.broadcast %81 : f32 to vector<16x128xf32>
    %83 = arith.addf %80, %82 : vector<16x128xf32>
    %cst_28 = arith.constant dense<0.000000e+00> : vector<16x16xf32>
    %84 = tpu.matmul %8, %65, %cst_28 {dimension_numbers = #tpu.dot_dimension_numbers<[1], [0], [0], [1], [0, 0, 1, 1], [], []>} : vector<16x16xf32>, vector<16x16xf32>, vector<16x16xf32> -> vector<16x16xf32>
    %c0_29 = arith.constant 0 : index
    %c0_30 = arith.constant 0 : index
    %85 = memref.load %arg4[%c0_29, %c0_30] : memref<2x9xf32, #tpu.memory_space<smem>>
    %86 = vector.broadcast %85 : f32 to vector<16x128xf32>
    %87 = arith.mulf %86, %27 : vector<16x128xf32>
    %c0_31 = arith.constant 0 : index
    %c1_32 = arith.constant 1 : index
    %88 = memref.load %arg4[%c0_31, %c1_32] : memref<2x9xf32, #tpu.memory_space<smem>>
    %89 = vector.broadcast %88 : f32 to vector<16x128xf32>
    %90 = arith.mulf %89, %37 : vector<16x128xf32>
    %91 = arith.addf %87, %90 : vector<16x128xf32>
    %c0_33 = arith.constant 0 : index
    %c2_34 = arith.constant 2 : index
    %92 = memref.load %arg4[%c0_33, %c2_34] : memref<2x9xf32, #tpu.memory_space<smem>>
    %93 = vector.broadcast %92 : f32 to vector<16x128xf32>
    %94 = arith.mulf %93, %47 : vector<16x128xf32>
    %95 = arith.addf %91, %94 : vector<16x128xf32>
    %cst_35 = arith.constant dense<0.000000e+00> : vector<16x128xf32>
    %96 = tpu.matmul %84, %95, %cst_35 {dimension_numbers = #tpu.dot_dimension_numbers<[1], [0], [0], [1], [0, 0, 1, 1], [], []>} : vector<16x16xf32>, vector<16x128xf32>, vector<16x128xf32> -> vector<16x128xf32>
    %97 = arith.addf %83, %96 : vector<16x128xf32>
    %c0_36 = arith.constant 0 : index
    %c3_37 = arith.constant 3 : index
    %98 = memref.load %arg4[%c0_36, %c3_37] : memref<2x9xf32, #tpu.memory_space<smem>>
    %99 = vector.broadcast %98 : f32 to vector<16x128xf32>
    %100 = arith.mulf %99, %27 : vector<16x128xf32>
    %c0_38 = arith.constant 0 : index
    %c4 = arith.constant 4 : index
    %101 = memref.load %arg4[%c0_38, %c4] : memref<2x9xf32, #tpu.memory_space<smem>>
    %102 = vector.broadcast %101 : f32 to vector<16x128xf32>
    %103 = arith.mulf %102, %37 : vector<16x128xf32>
    %104 = arith.addf %100, %103 : vector<16x128xf32>
    %c0_39 = arith.constant 0 : index
    %c5 = arith.constant 5 : index
    %105 = memref.load %arg4[%c0_39, %c5] : memref<2x9xf32, #tpu.memory_space<smem>>
    %106 = vector.broadcast %105 : f32 to vector<16x128xf32>
    %107 = arith.mulf %106, %47 : vector<16x128xf32>
    %108 = arith.addf %104, %107 : vector<16x128xf32>
    %cst_40 = arith.constant dense<0.000000e+00> : vector<16x128xf32>
    %109 = tpu.matmul %65, %108, %cst_40 {dimension_numbers = #tpu.dot_dimension_numbers<[1], [0], [0], [1], [0, 0, 1, 1], [], []>} : vector<16x16xf32>, vector<16x128xf32>, vector<16x128xf32> -> vector<16x128xf32>
    %110 = arith.addf %97, %109 : vector<16x128xf32>
    %cst_41 = arith.constant dense<0.000000e+00> : vector<16x16xf32>
    %111 = tpu.matmul %15, %65, %cst_41 {dimension_numbers = #tpu.dot_dimension_numbers<[1], [0], [0], [1], [0, 0, 1, 1], [], []>} : vector<16x16xf32>, vector<16x16xf32>, vector<16x16xf32> -> vector<16x16xf32>
    %c0_42 = arith.constant 0 : index
    %c6 = arith.constant 6 : index
    %112 = memref.load %arg4[%c0_42, %c6] : memref<2x9xf32, #tpu.memory_space<smem>>
    %113 = vector.broadcast %112 : f32 to vector<16x128xf32>
    %114 = arith.mulf %113, %27 : vector<16x128xf32>
    %c0_43 = arith.constant 0 : index
    %c7 = arith.constant 7 : index
    %115 = memref.load %arg4[%c0_43, %c7] : memref<2x9xf32, #tpu.memory_space<smem>>
    %116 = vector.broadcast %115 : f32 to vector<16x128xf32>
    %117 = arith.mulf %116, %37 : vector<16x128xf32>
    %118 = arith.addf %114, %117 : vector<16x128xf32>
    %c0_44 = arith.constant 0 : index
    %c8 = arith.constant 8 : index
    %119 = memref.load %arg4[%c0_44, %c8] : memref<2x9xf32, #tpu.memory_space<smem>>
    %120 = vector.broadcast %119 : f32 to vector<16x128xf32>
    %121 = arith.mulf %120, %47 : vector<16x128xf32>
    %122 = arith.addf %118, %121 : vector<16x128xf32>
    %cst_45 = arith.constant dense<0.000000e+00> : vector<16x128xf32>
    %123 = tpu.matmul %111, %122, %cst_45 {dimension_numbers = #tpu.dot_dimension_numbers<[1], [0], [0], [1], [0, 0, 1, 1], [], []>} : vector<16x16xf32>, vector<16x128xf32>, vector<16x128xf32> -> vector<16x128xf32>
    %124 = arith.addf %110, %123 : vector<16x128xf32>
    %cst_46 = arith.constant 0.000000e+00 : f32
    %125 = vector.broadcast %cst_46 : f32 to vector<16x128xf32>
    %c1_47 = arith.constant 1 : index
    %126 = memref.load %arg5[%c1_47] : memref<2xf32, #tpu.memory_space<smem>>
    %127 = vector.broadcast %126 : f32 to vector<16x128xf32>
    %128 = arith.addf %125, %127 : vector<16x128xf32>
    %cst_48 = arith.constant dense<0.000000e+00> : vector<16x16xf32>
    %129 = tpu.matmul %8, %79, %cst_48 {dimension_numbers = #tpu.dot_dimension_numbers<[1], [0], [0], [1], [0, 0, 1, 1], [], []>} : vector<16x16xf32>, vector<16x16xf32>, vector<16x16xf32> -> vector<16x16xf32>
    %c1_49 = arith.constant 1 : index
    %c0_50 = arith.constant 0 : index
    %130 = memref.load %arg4[%c1_49, %c0_50] : memref<2x9xf32, #tpu.memory_space<smem>>
    %131 = vector.broadcast %130 : f32 to vector<16x128xf32>
    %132 = arith.mulf %131, %27 : vector<16x128xf32>
    %c1_51 = arith.constant 1 : index
    %c1_52 = arith.constant 1 : index
    %133 = memref.load %arg4[%c1_51, %c1_52] : memref<2x9xf32, #tpu.memory_space<smem>>
    %134 = vector.broadcast %133 : f32 to vector<16x128xf32>
    %135 = arith.mulf %134, %37 : vector<16x128xf32>
    %136 = arith.addf %132, %135 : vector<16x128xf32>
    %c1_53 = arith.constant 1 : index
    %c2_54 = arith.constant 2 : index
    %137 = memref.load %arg4[%c1_53, %c2_54] : memref<2x9xf32, #tpu.memory_space<smem>>
    %138 = vector.broadcast %137 : f32 to vector<16x128xf32>
    %139 = arith.mulf %138, %47 : vector<16x128xf32>
    %140 = arith.addf %136, %139 : vector<16x128xf32>
    %cst_55 = arith.constant dense<0.000000e+00> : vector<16x128xf32>
    %141 = tpu.matmul %129, %140, %cst_55 {dimension_numbers = #tpu.dot_dimension_numbers<[1], [0], [0], [1], [0, 0, 1, 1], [], []>} : vector<16x16xf32>, vector<16x128xf32>, vector<16x128xf32> -> vector<16x128xf32>
    %142 = arith.addf %128, %141 : vector<16x128xf32>
    %c1_56 = arith.constant 1 : index
    %c3_57 = arith.constant 3 : index
    %143 = memref.load %arg4[%c1_56, %c3_57] : memref<2x9xf32, #tpu.memory_space<smem>>
    %144 = vector.broadcast %143 : f32 to vector<16x128xf32>
    %145 = arith.mulf %144, %27 : vector<16x128xf32>
    %c1_58 = arith.constant 1 : index
    %c4_59 = arith.constant 4 : index
    %146 = memref.load %arg4[%c1_58, %c4_59] : memref<2x9xf32, #tpu.memory_space<smem>>
    %147 = vector.broadcast %146 : f32 to vector<16x128xf32>
    %148 = arith.mulf %147, %37 : vector<16x128xf32>
    %149 = arith.addf %145, %148 : vector<16x128xf32>
    %c1_60 = arith.constant 1 : index
    %c5_61 = arith.constant 5 : index
    %150 = memref.load %arg4[%c1_60, %c5_61] : memref<2x9xf32, #tpu.memory_space<smem>>
    %151 = vector.broadcast %150 : f32 to vector<16x128xf32>
    %152 = arith.mulf %151, %47 : vector<16x128xf32>
    %153 = arith.addf %149, %152 : vector<16x128xf32>
    %cst_62 = arith.constant dense<0.000000e+00> : vector<16x128xf32>
    %154 = tpu.matmul %79, %153, %cst_62 {dimension_numbers = #tpu.dot_dimension_numbers<[1], [0], [0], [1], [0, 0, 1, 1], [], []>} : vector<16x16xf32>, vector<16x128xf32>, vector<16x128xf32> -> vector<16x128xf32>
    %155 = arith.addf %142, %154 : vector<16x128xf32>
    %cst_63 = arith.constant dense<0.000000e+00> : vector<16x16xf32>
    %156 = tpu.matmul %15, %79, %cst_63 {dimension_numbers = #tpu.dot_dimension_numbers<[1], [0], [0], [1], [0, 0, 1, 1], [], []>} : vector<16x16xf32>, vector<16x16xf32>, vector<16x16xf32> -> vector<16x16xf32>
    %c1_64 = arith.constant 1 : index
    %c6_65 = arith.constant 6 : index
    %157 = memref.load %arg4[%c1_64, %c6_65] : memref<2x9xf32, #tpu.memory_space<smem>>
    %158 = vector.broadcast %157 : f32 to vector<16x128xf32>
    %159 = arith.mulf %158, %27 : vector<16x128xf32>
    %c1_66 = arith.constant 1 : index
    %c7_67 = arith.constant 7 : index
    %160 = memref.load %arg4[%c1_66, %c7_67] : memref<2x9xf32, #tpu.memory_space<smem>>
    %161 = vector.broadcast %160 : f32 to vector<16x128xf32>
    %162 = arith.mulf %161, %37 : vector<16x128xf32>
    %163 = arith.addf %159, %162 : vector<16x128xf32>
    %c1_68 = arith.constant 1 : index
    %c8_69 = arith.constant 8 : index
    %164 = memref.load %arg4[%c1_68, %c8_69] : memref<2x9xf32, #tpu.memory_space<smem>>
    %165 = vector.broadcast %164 : f32 to vector<16x128xf32>
    %166 = arith.mulf %165, %47 : vector<16x128xf32>
    %167 = arith.addf %163, %166 : vector<16x128xf32>
    %cst_70 = arith.constant dense<0.000000e+00> : vector<16x128xf32>
    %168 = tpu.matmul %156, %167, %cst_70 {dimension_numbers = #tpu.dot_dimension_numbers<[1], [0], [0], [1], [0, 0, 1, 1], [], []>} : vector<16x16xf32>, vector<16x128xf32>, vector<16x128xf32> -> vector<16x128xf32>
    %169 = arith.addf %155, %168 : vector<16x128xf32>
    %cst_71 = arith.constant 0.000000e+00 : f32
    %170 = vector.broadcast %cst_71 : f32 to vector<16x128xf32>
    %c0_72 = arith.constant 0 : index
    %171 = memref.load %arg7[%c0_72] : memref<2xf32, #tpu.memory_space<smem>>
    %172 = vector.broadcast %171 : f32 to vector<16x128xf32>
    %173 = arith.addf %170, %172 : vector<16x128xf32>
    %c0_73 = arith.constant 0 : index
    %c0_74 = arith.constant 0 : index
    %174 = memref.load %arg6[%c0_73, %c0_74] : memref<2x2xf32, #tpu.memory_space<smem>>
    %175 = vector.broadcast %174 : f32 to vector<16x128xf32>
    %176 = arith.mulf %124, %175 : vector<16x128xf32>
    %177 = arith.addf %173, %176 : vector<16x128xf32>
    %c1_75 = arith.constant 1 : index
    %c0_76 = arith.constant 0 : index
    %178 = memref.load %arg6[%c1_75, %c0_76] : memref<2x2xf32, #tpu.memory_space<smem>>
    %179 = vector.broadcast %178 : f32 to vector<16x128xf32>
    %180 = arith.mulf %169, %179 : vector<16x128xf32>
    %181 = arith.addf %177, %180 : vector<16x128xf32>
    %cst_77 = arith.constant 0.000000e+00 : f32
    %182 = vector.broadcast %cst_77 : f32 to vector<16x128xf32>
    %183 = arith.maximumf %181, %182 : vector<16x128xf32>
    %cst_78 = arith.constant 0.000000e+00 : f32
    %184 = vector.broadcast %cst_78 : f32 to vector<16x128xf32>
    %c1_79 = arith.constant 1 : index
    %185 = memref.load %arg7[%c1_79] : memref<2xf32, #tpu.memory_space<smem>>
    %186 = vector.broadcast %185 : f32 to vector<16x128xf32>
    %187 = arith.addf %184, %186 : vector<16x128xf32>
    %c0_80 = arith.constant 0 : index
    %c1_81 = arith.constant 1 : index
    %188 = memref.load %arg6[%c0_80, %c1_81] : memref<2x2xf32, #tpu.memory_space<smem>>
    %189 = vector.broadcast %188 : f32 to vector<16x128xf32>
    %190 = arith.mulf %124, %189 : vector<16x128xf32>
    %191 = arith.addf %187, %190 : vector<16x128xf32>
    %c1_82 = arith.constant 1 : index
    %c1_83 = arith.constant 1 : index
    %192 = memref.load %arg6[%c1_82, %c1_83] : memref<2x2xf32, #tpu.memory_space<smem>>
    %193 = vector.broadcast %192 : f32 to vector<16x128xf32>
    %194 = arith.mulf %169, %193 : vector<16x128xf32>
    %195 = arith.addf %191, %194 : vector<16x128xf32>
    %cst_84 = arith.constant 0.000000e+00 : f32
    %196 = vector.broadcast %cst_84 : f32 to vector<16x128xf32>
    %197 = arith.maximumf %195, %196 : vector<16x128xf32>
    %c0_85 = arith.constant 0 : index
    %c0_86 = arith.constant 0 : index
    %c0_87 = arith.constant 0 : index
    %c0_88 = arith.constant 0 : index
    %198 = vector.load %arg1[%c0_85, %c0_86, %c0_87, %c0_88] : memref<1x4x16x16xf32, #tpu.memory_space<vmem>>, vector<1x1x16x16xf32>
    %199 = vector.shape_cast %198 : vector<1x1x16x16xf32> to vector<16x16xf32>
    %c0_89 = arith.constant 0 : index
    %c0_90 = arith.constant 0 : index
    %c0_91 = arith.constant 0 : index
    %c0_92 = arith.constant 0 : index
    %200 = vector.load %arg8[%c0_89, %c0_90, %c0_91, %c0_92] : memref<1x4x16x128xf32, #tpu.memory_space<vmem>>, vector<1x1x16x16xf32>
    %201 = vector.shape_cast %200 : vector<1x1x16x16xf32> to vector<16x16xf32>
    %202 = vector.shape_cast %199 : vector<16x16xf32> to vector<1x1x16x16xf32>
    tpu.vector_store %arg8[%c0_89, %c0_90, %c0_91, %c0_92], %202 {strides = array<i32>} : memref<1x4x16x128xf32, #tpu.memory_space<vmem>>, vector<1x1x16x16xf32>,
    %c0_93 = arith.constant 0 : index
    %c1_94 = arith.constant 1 : index
    %c0_95 = arith.constant 0 : index
    %c0_96 = arith.constant 0 : index
    %203 = vector.load %arg8[%c0_93, %c1_94, %c0_95, %c0_96] : memref<1x4x16x128xf32, #tpu.memory_space<vmem>>, vector<1x1x16x128xf32>
    %204 = vector.shape_cast %203 : vector<1x1x16x128xf32> to vector<16x128xf32>
    %205 = vector.shape_cast %183 : vector<16x128xf32> to vector<1x1x16x128xf32>
    tpu.vector_store %arg8[%c0_93, %c1_94, %c0_95, %c0_96], %205 {strides = array<i32>} : memref<1x4x16x128xf32, #tpu.memory_space<vmem>>, vector<1x1x16x128xf32>,
    %c0_97 = arith.constant 0 : index
    %c1_98 = arith.constant 1 : index
    %c0_99 = arith.constant 0 : index
    %c0_100 = arith.constant 0 : index
    %206 = vector.load %arg1[%c0_97, %c1_98, %c0_99, %c0_100] : memref<1x4x16x16xf32, #tpu.memory_space<vmem>>, vector<1x1x16x16xf32>
    %207 = vector.shape_cast %206 : vector<1x1x16x16xf32> to vector<16x16xf32>
    %c0_101 = arith.constant 0 : index
    %c2_102 = arith.constant 2 : index
    %c0_103 = arith.constant 0 : index
    %c0_104 = arith.constant 0 : index
    %208 = vector.load %arg8[%c0_101, %c2_102, %c0_103, %c0_104] : memref<1x4x16x128xf32, #tpu.memory_space<vmem>>, vector<1x1x16x16xf32>
    %209 = vector.shape_cast %208 : vector<1x1x16x16xf32> to vector<16x16xf32>
    %210 = vector.shape_cast %207 : vector<16x16xf32> to vector<1x1x16x16xf32>
    tpu.vector_store %arg8[%c0_101, %c2_102, %c0_103, %c0_104], %210 {strides = array<i32>} : memref<1x4x16x128xf32, #tpu.memory_space<vmem>>, vector<1x1x16x16xf32>,
    %c0_105 = arith.constant 0 : index
    %c3_106 = arith.constant 3 : index
    %c0_107 = arith.constant 0 : index
    %c0_108 = arith.constant 0 : index
    %211 = vector.load %arg8[%c0_105, %c3_106, %c0_107, %c0_108] : memref<1x4x16x128xf32, #tpu.memory_space<vmem>>, vector<1x1x16x128xf32>
    %212 = vector.shape_cast %211 : vector<1x1x16x128xf32> to vector<16x128xf32>
    %213 = vector.shape_cast %197 : vector<16x128xf32> to vector<1x1x16x128xf32>
    tpu.vector_store %arg8[%c0_105, %c3_106, %c0_107, %c0_108], %213 {strides = array<i32>} : memref<1x4x16x128xf32, #tpu.memory_space<vmem>>, vector<1x1x16x128xf32>,
    return
  }
  func.func @transform_0(%arg0: i32) -> (i32, i32, i32, i32) {
    %c0_i32 = arith.constant 0 : i32
    %c0_i32_0 = arith.constant 0 : i32
    %c0_i32_1 = arith.constant 0 : i32
    %c0_i32_2 = arith.constant 0 : i32
    return %arg0, %c0_i32, %c0_i32_0, %c0_i32_1 : i32, i32, i32, i32
  }
  func.func @transform_1(%arg0: i32) -> (i32, i32) {
    %c0_i32 = arith.constant 0 : i32
    %c0_i32_0 = arith.constant 0 : i32
    %c0_i32_1 = arith.constant 0 : i32
    return %c0_i32, %c0_i32_0 : i32, i32
  }
  func.func @transform_2(%arg0: i32) -> i32 {
    %c0_i32 = arith.constant 0 : i32
    %c0_i32_0 = arith.constant 0 : i32
    return %c0_i32 : i32
  }
  func.func @transform_3(%arg0: i32) -> (i32, i32) {
    %c0_i32 = arith.constant 0 : i32
    %c0_i32_0 = arith.constant 0 : i32
    %c0_i32_1 = arith.constant 0 : i32
    return %c0_i32, %c0_i32_0 : i32, i32
  }
  func.func @transform_4(%arg0: i32) -> i32 {
    %c0_i32 = arith.constant 0 : i32
    %c0_i32_0 = arith.constant 0 : i32
    return %c0_i32 : i32
  }
  func.func @transform_5(%arg0: i32) -> (i32, i32) {
    %c0_i32 = arith.constant 0 : i32
    %c0_i32_0 = arith.constant 0 : i32
    %c0_i32_1 = arith.constant 0 : i32
    return %c0_i32, %c0_i32_0 : i32, i32
  }
  func.func @transform_6(%arg0: i32) -> i32 {
    %c0_i32 = arith.constant 0 : i32
    %c0_i32_0 = arith.constant 0 : i32
    return %c0_i32 : i32
  }
  func.func @transform_7(%arg0: i32) -> (i32, i32, i32, i32) {
    %c0_i32 = arith.constant 0 : i32
    %c0_i32_0 = arith.constant 0 : i32
    %c0_i32_1 = arith.constant 0 : i32
    %c0_i32_2 = arith.constant 0 : i32
    return %arg0, %c0_i32, %c0_i32_0, %c0_i32_1 : i32, i32, i32, i32
  }
}

</mosaic_0001>

<bundles_post_ra>
// kernel: tpu_custom_call.1
= control target key start
LH: loop header
LB: loop body
LE: loop exit
PB: predicated region body
PF: predicated region fallthrough
CT: control target
= control target key end

     0   :  { %s2629_s0 = inlined_call_operand.hbm [shape: f32[2,4,16,16], index: 0, kind: input, shape index: {}]   ;;  %s2630_s1 = inlined_call_operand.hbm [shape: f32[2,2], index: 1, kind: input, shape index: {}]   ;;  %s2631_s2 = inlined_call_operand.vmem [shape: f32[2], index: 2, kind: input, shape index: {}]   ;;  %s2632_s3 = inlined_call_operand.vmem [shape: f32[2,9], index: 3, kind: input, shape index: {}]   ;;  %s2633_s4 = inlined_call_operand.vmem [shape: f32[2], index: 4, kind: input, shape index: {}]   ;;  %s2634_s5 = inlined_call_operand.vmem [shape: f32[2,2], index: 5, kind: input, shape index: {}]   ;;  %s2635_s6 = inlined_call_operand.vmem [shape: f32[2], index: 6, kind: input, shape index: {}]   ;;  %s2636_s7 = inlined_call_operand.hbm [shape: f32[2,4,16,128], index: 7, kind: output, shape index: {}]  }
   0x1   :  { %2641 = sst [smem:[#allocation22_spill]] %s2630_s1 }
   0x2   :  { %12 = vsyncpa [#allocation3], 0 }
   0x3   :  { %14 = vsyncpa [#allocation3 + $0x1], 0 }
   0x4   :  { %15 = vsyncpa [#allocation5], 0 }
   0x5   :  { %16 = vsyncpa [#allocation6], 0 }
   0x6   :  { %17 = vsyncpa [#allocation10], 0 }
   0x7   :  { %18 = vsyncpa [#allocation13], 0 }
   0x8   :  { %19 = vsyncpa [#allocation4], 0 }
   0x9   :  { %21 = vsyncpa [#allocation4 + $0x1], 0  ;;  %s2139_s24 = smov 0   ;;  %s2141_s25 = smov 0  }
   0xa   :  { %s2143_s26 = smov 0   ;;  %s2145_s27 = smov 0  }
   0xb LB: > { %s243_s30 = sshll.u32 %s2632_s3, 4  ;;  %s2163_s8 = sadd.s32 4294967295, %s2084_s27   ;;  %s2084_s27 = sphi %s2145_s27, %s2672_s27   ;;  %s2080_s26 = sphi %s2143_s26, %s2671_s26   ;;  %s2076_s25 = sphi %s2141_s25, %s2670_s25   ;;  %s2072_s24 = sphi %s2139_s24, %s2669_s24   ;;  %s244_s30 = int_to_ptr.vmem [resolvable:$true] %s243_s30 }
   0xc   : > { %p1573_p0 = scmp.ge.s32.totalorder %s2084_s27, 1  ;;  %p2637_p1 = scmp.eq.s32.totalorder %s2163_s8, 0 }
   0xd   : > { %p210_p2 = scmp.lt.s32.totalorder %s2084_s27, 3  ;;  %s265_s12 = sshll.u32 %s2634_s5, 4  ;;  %s266_s12 = int_to_ptr.vmem [resolvable:$true] %s265_s12 }
   0xe   : > { %s232_s15 = sshll.u32 %s2631_s2, 4  ;;  %s254_s19 = sshll.u32 %s2633_s4, 4  ;;  %s2187_s15 = int_to_ptr.vmem [resolvable:$true] %s232_s15  ;;  %s2192_s19 = int_to_ptr.vmem [resolvable:$true] %s254_s19 }
   0xf   : > { %p2168_p3 = pnand %p1573_p0, %p210_p2  ;;  %s1890_s20 = scalar_lea.vmem %s244_s30, 32 }
  0x10   : > { %p1891_p7 = scmp.ne.s32.totalorder %s244_s30, %s1890_s20  ;;  %p1898_p11 = scmp.lt.s32.totalorder %s244_s30, %s244_s30 }
  0x11   : > { %s2642_s9 = scalar_select %p2168_p3, 1, 0 }
  0x12   : > { %p1806_p5 = pneg %p2168_p3  ;;  %p1899_p12 = scmp.lt.s32.totalorder %s1890_s20, %s1890_s20 }
  0x14   : > { %p2183_p6 = pnand %p1806_p5, %p2637_p1  ;;  %p1900_p13 = por %p1899_p12, %p1898_p11 }
  0x16   : > { %p2196_p8 = pneg %p2183_p6 }
  0x18   : > { %p1893_p9 = pnand %p2196_p8, %p1891_p7 }
  0x1a   : > { %p1894_p10 = pneg %p1893_p9 }
  0x1c   : > { %p1901_p0 = pnand %p1900_p13, %p1894_p10 }
  0x1e   : > { %1904 = shalt.err (!%p1901_p0)
}
  0x1f   : > { %s2086_s22 = smov [#allocation9]   ;;  %s1905_s23 = scalar_lea.vmem %s266_s12, 32 }
  0x20   : > { %1815 = dma.vmem_to_smem (!%p2183_p6), %s244_s30, 32, %s2086_s22, [#allocation10]  }
  0x21   : > { %p1906_p2 = scmp.ne.s32.totalorder %s266_s12, %s1905_s23  ;;  %p1913_p1 = scmp.lt.s32.totalorder %s266_s12, %s266_s12 }
  0x22   : > { %p1914_p3 = scmp.lt.s32.totalorder %s1905_s23, %s1905_s23 }
  0x23   : > { %p1908_p5 = pnand %p1906_p2, %p2196_p8 }
  0x24   : > { %p1915_p7 = por %p1914_p3, %p1913_p1 }
  0x25   : > { %p1909_p4 = pneg %p1908_p5 }
  0x27   : > { %p1916_p9 = pnand %p1915_p7, %p1909_p4 }
  0x29   : > { %1919 = shalt.err (!%p1916_p9)
}
  0x2a   : > { %s2087_s28 = smov [#allocation12]   ;;  %s2088_s29 = smov [#allocation7]  }
  0x2b   : > { %1821 = dma.vmem_to_smem (!%p2183_p6), %s266_s12, 32, %s2087_s28, [#allocation13]  }
  0x2c   : > { %s2645_s1 = sld [smem:[#allocation22_spill]]  ;;  %s1931_s11 = scalar_lea.vmem %s2187_s15, 16 }
  0x2d   : > { %p1932_p10 = scmp.ne.s32.totalorder %s2187_s15, %s1931_s11  ;;  %p1939_p4 = scmp.lt.s32.totalorder %s2187_s15, %s2187_s15 }
  0x2e   : > { %p1940_p11 = scmp.lt.s32.totalorder %s1931_s11, %s1931_s11 }
  0x2f   : > { %p1934_p1 = pnand %p1932_p10, %p2196_p8 }
  0x30   : > { %p1941_p12 = por %p1940_p11, %p1939_p4 }
  0x31   : > { %p1935_p3 = pneg %p1934_p1 }
  0x32   : > { %1809 = dma.hbm_to_smem (!%p2183_p6), %s2645_s1, 32, %s2088_s29, [#allocation5]  }
  0x33   : > { %p1942_p13 = pnand %p1941_p12, %p1935_p3 }
  0x35   : > { %1945 = shalt.err (!%p1942_p13)
}
  0x36   : > { %s2089_s13 = smov [#allocation8]   ;;  %s276_s17 = sshll.u32 %s2635_s6, 4  ;;  %s277_s17 = int_to_ptr.vmem [resolvable:$true] %s276_s17 }
  0x37   : > { %1812 = dma.vmem_to_smem (!%p2183_p6), %s2187_s15, 16, %s2089_s13, [#allocation6]  }
  0x38   : > { %s1946_s18 = scalar_lea.vmem %s2192_s19, 16  ;;  %p1954_p7 = scmp.lt.s32.totalorder %s2192_s19, %s2192_s19 }
  0x39   : > { %p1947_p0 = scmp.ne.s32.totalorder %s2192_s19, %s1946_s18  ;;  %p1955_p9 = scmp.lt.s32.totalorder %s1946_s18, %s1946_s18 }
  0x3b   : > { %p1949_p2 = pnand %p1947_p0, %p2196_p8  ;;  %p1956_p10 = por %p1955_p9, %p1954_p7 }
  0x3d   : > { %p1950_p5 = pneg %p1949_p2 }
  0x3f   : > { %p1957_p1 = pnand %p1956_p10, %p1950_p5 }
  0x41   : > { %1960 = shalt.err (!%p1957_p1)
}
  0x42   : > { %s2090_s20 = smov [#allocation11]   ;;  %s1961_s15 = scalar_lea.vmem %s277_s17, 16 }
  0x43   : > { %1818 = dma.vmem_to_smem (!%p2183_p6), %s2192_s19, 16, %s2090_s20, [#allocation10]  }
  0x44   : > { %p1962_p3 = scmp.ne.s32.totalorder %s277_s17, %s1961_s15  ;;  %p1969_p12 = scmp.lt.s32.totalorder %s277_s17, %s277_s17 }
  0x45   : > { %p1970_p13 = scmp.lt.s32.totalorder %s1961_s15, %s1961_s15 }
  0x46   : > { %p1964_p4 = pnand %p1962_p3, %p2196_p8 }
  0x47   : > { %p1971_p0 = por %p1970_p13, %p1969_p12 }
  0x48   : > { %p1965_p11 = pneg %p1964_p4 }
  0x4a   : > { %p1972_p2 = pnand %p1971_p0, %p1965_p11 }
  0x4c   : > { %1975 = shalt.err (!%p1972_p2)
}
  0x4d   : > { %s2091_s22 = smov [#allocation14]   ;;  %s1572_s19 = sadd.s32 4294967294, %s2084_s27  }
  0x4e   : > { %1824 = dma.vmem_to_smem (!%p2183_p6), %s277_s17, 16, %s2091_s22, [#allocation13]  }
  0x4f   : > { %s2240_s21 = sadd.s32 1, %s2084_s27   ;;  %s34_s23 = sadd.s32 1, %s2080_s26 }
  0x50   : > { %s31_s16 = ssub.s32 %s2084_s27, %s2240_s21  ;;  %p41_p5 = scmp.ne.s32.totalorder %s2080_s26, %s2076_s25 }
  0x51   : > { %p32_p8 = scmp.eq.s32.totalorder %s31_s16, 0  ;;  %p42_p7 = scmp.eq.s32.totalorder %s2084_s27, 0 }
  0x52   : > { %p47_p9 = scmp.ne.s32.totalorder %s2076_s25, %s2072_s24  ;;  %p2647_p1 = scmp.eq.s32.totalorder %s2163_s8, 0 }
  0x53   : > { %s2251_s28 = scalar_select %p32_p8, %s2080_s26, %s34_s23  }
  0x54   : > { %p2253_p10 = por %p42_p7, %p41_p5  ;;  %p2259_p6 = por %p2647_p1, %p47_p9 }
  0x55   : > { %p197_p3 = scmp.eq.s32.totalorder %s2163_s8, 1  ;;  %p203_p4 = scmp.eq.s32.totalorder %s1572_s19, 1 }
  0x56   : > { %s2648_s30 = scalar_select %p2259_p6, 1, 0 }
  0x57   : > { %p1839_p11 = scmp.lt.s32.totalorder %s2084_s27, 2  ;;  %s287_s10 = sand.u32 1, %s2080_s26  }
  0x58   : > { %p2266_p12 = por %p197_p3, %p41_p5  ;;  %p2270_p13 = por %p203_p4, %p47_p9 }
  0x59   : > { %s1581_s12 = sshll.u32 %s287_s10, 6  ;;  %s1666_s14 = sshll.u32 %s2084_s27, 10 }
  0x5a   : > { %s2649_s11 = scalar_select %p2266_p12, 1, 0 }
  0x5b   : > { %s2650_s13 = scalar_select %p2270_p13, 1, 0 }
  0x5c   : > { %s2278_s20 = scalar_lea.hbm %s2629_s0, %s1666_s14  ;;  %s291_s15 = scalar_lea.vmem [#allocation2], %s1581_s12 }
  0x5d   : > { %s298_s22 = sshll.u32 %s291_s15, 4  ;;  %p2284_p0 = pnand %p1839_p11, %p2253_p10  ;;  %s2280_s22 = int_to_ptr.vmem [resolvable:$true] %s298_s22 }
  0x5e   : > { %s2288_s16 = scalar_lea.sflag [#allocation3], %s287_s10  ;;  %s1976_s23 = scalar_lea.hbm %s2278_s20, 1024 }
  0x5f   : > { %p1977_p2 = scmp.ne.s32.totalorder %s2278_s20, %s1976_s23  ;;  %p1978_p8 = pneg %p2284_p0 }
  0x60   : > { %s1981_s12 = scalar_lea.hbm %s2629_s0, 2048  ;;  %p1982_p9 = scmp.lt.s32.totalorder %s2278_s20, %s2629_s0 }
  0x61   : > { %p1979_p5 = pnand %p1978_p8, %p1977_p2  ;;  %p1983_p10 = scmp.lt.s32.totalorder %s1981_s12, %s1976_s23 }
  0x63   : > { %p1980_p7 = pneg %p1979_p5  ;;  %p1984_p1 = por %p1983_p10, %p1982_p9 }
  0x65   : > { %p1985_p3 = pnand %p1984_p1, %p1980_p7 }
  0x67   : > { %1988 = shalt.err (!%p1985_p3)
}
  0x68   : > { %s1989_s29 = scalar_lea.vmem %s2280_s22, 1024  ;;  %s2092_s10 = smov [#allocation2]  }
  0x69   : > { %p1990_p4 = scmp.ne.s32.totalorder %s2280_s22, %s1989_s29  ;;  %s1994_s1 = sshll.u32 %s2092_s10, 4  ;;  %s1995_s1 = int_to_ptr.vmem [resolvable:$false] %s1994_s1 }
  0x6a   : > { %s1996_s14 = scalar_lea.vmem %s1995_s1, 2048  ;;  %p1997_p5 = scmp.lt.s32.totalorder %s2280_s22, %s1995_s1 }
  0x6b   : > { %p1992_p11 = pnand %p1990_p4, %p1978_p8  ;;  %p1998_p13 = scmp.lt.s32.totalorder %s1996_s14, %s1989_s29 }
  0x6d   : > { %p1993_p2 = pneg %p1992_p11  ;;  %p1999_p12 = por %p1998_p13, %p1997_p5 }
  0x6f   : > { %p2000_p6 = pnand %p1999_p12, %p1993_p2 }
  0x71   : > { %2003 = shalt.err (!%p2000_p6)
}
  0x72   : > { %s2093_s23 = smov 128   ;;  %s2094_s17 = smov 8  }
  0x73   : > { %1828 = dma.hbm_to_vmem [thread:$0]  (!%p2284_p0), %s2278_s20, 1024, %s2280_s22, %s2288_s16, %s2093_s23, %s2093_s23, %s2094_s17  }
  0x74   : > { %p2652_p8 = scmp.ne.s32.totalorder %s2642_s9, 0 }
  0x75   : > { %s2312_s12 = sand.u32 (!%p2652_p8), 1, %s2076_s25   ;;  %p2653_p6 = scmp.ne.s32.totalorder (!%p2652_p8), %s2648_s30, 0 }
  0x76   : > { %310 = sbr.rel (%p2652_p8) target bundleno = 976 (0x3d0), region = 48  ;;  %s1585_s1 = sshll.u32 (!%p2652_p8), %s2312_s12, 6 }
  0x77   : > { %s313_s18 = scalar_lea.sflag (!%p2652_p8), [#allocation3], %s2312_s12  ;;  %s2318_s15 = scalar_lea.vmem (!%p2652_p8), [#allocation2], %s1585_s1 }
  0x7b   : > { %2047 = dma.done.wait (%p2653_p6), %s313_s18, 1024  }
  0x7c   : > { %2049 = vsyncadd (%p2653_p6), %s313_s18, 4294966272  ;;  %p2654_p12 = scmp.eq.s32.totalorder %s2163_s8, 0 }
  0x7e   : > { %2051 = dma.done.wait (%p2654_p12), [#allocation5], 32   ;;  %p2655_p13 = pmov %p2654_p12 }
  0x7f   : > { %p2656_p0 = pmov %p2654_p12 }
  0x80   : > { %2053 = vsyncadd (%p2655_p13), [#allocation5], 4294967264 }
  0x81   : > { %2055 = dma.done.wait (%p2656_p0), [#allocation6], 16   ;;  %p2657_p7 = pmov %p2656_p0 }
  0x82   : > { %p2658_p9 = pmov %p2656_p0 }
  0x83   : > { %2057 = vsyncadd (%p2657_p7), [#allocation6], 4294967280 }
  0x84   : > { %2059 = dma.done.wait (%p2658_p9), [#allocation10], 48   ;;  %p2659_p10 = pmov %p2656_p0 }
  0x85   : > { %p2660_p1 = pmov %p2656_p0 }
  0x86   : > { %2061 = vsyncadd (%p2659_p10), [#allocation10], 4294967248 }
  0x87   : > { %2063 = dma.done.wait (%p2660_p1), [#allocation13], 48   ;;  %p2661_p3 = pmov %p2656_p0 }
  0x89   : > { %2065 = vsyncadd (%p2661_p3), [#allocation13], 4294967248 }
  0x8a   : > { %345 = sfence }
  0x8b   : > { %s2340_s9 = sld [smem:[#allocation8]]  ;;  %v372_v0 = vlaneseq  ;;  %v2351_v3 = vld [vmem:[%s2318_s15 + $0x28] sm:$0xff]  ;;  %v2358_v6 = vld [vmem:[%s2318_s15 + $0x20] sm:$0xff]  ;;  %vm463_vm0 = vcmask 130048   ;;  %v2367_v8 = vld [vmem:[%s2318_s15 + $0x38] sm:$0xff]  ;;  %v2095_v13 = vmov 0.0  }
  0x8c   : > { %s429_s30 = sld [smem:[#allocation7]]  ;;  %v2371_v10 = vld [vmem:[%s2318_s15 + $0x30] sm:$0xff]  ;;  %p2666_p11 = scmp.ne.s32.totalorder %s2649_s11, 0 }
  0x8d   : > { %s2342_s20 = sld [smem:[#allocation7 + $0x80]]  ;;  %v2344_v1 = vshrl.u32 %v372_v0, 7  ;;  %v2346_v2 = vand.u32 127, %v372_v0 }
  0x8e   : > { %s2348_s22 = sld [smem:[#allocation9]] }
  0x8f   : > { %v377_v4 = vadd.s32 4294967295, %v2344_v1  ;;  %v393_v5 = vadd.s32 4294967295, %v2346_v2  ;;  %s2355_s19 = sld [smem:[#allocation9 + $0x1]]  ;;  %v2361_v7 = vadd.s32 8, %v2344_v1  ;;  %vm396_vm1 = vcmp.lt.s32.totalorder %v2346_v2, 16 }
  0x90   : > { %s2364_s16 = sld [smem:[#allocation9 + $0x2]]  ;;  %v411_v11 = vadd.s32 1, %v2346_v2  ;;  %vm403_vm14 = vcmp.eq.s32.totalorder %v2344_v1, %v2346_v2 }
  0x91   : > { %v427_v9 = vstv %s2340_s9  ;;  %vm379_vm2 = vcmp.eq.s32.totalorder %v2346_v2, %v377_v4  ;;  %vm394_vm3 = vcmp.eq.s32.totalorder %v2344_v1, %v393_v5  ;;  %vm395_vm4 = vcmp.eq.s32.totalorder %v2361_v7, %v393_v5  ;;  %vm405_vm15 = vmand %vm403_vm14, %vm396_vm1  ;;  %s1617_s29 = sld [smem:[#allocation9 + $0x3]] }
  0x92   : > { %v430_v12 = vstv %s429_s30  ;;  %v2377_v14 = vsel %vm379_vm2, 1.0, %v2095_v13  ;;  %vm2382_vm5 = vmand %vm394_vm3, %vm396_vm1  ;;  %vm404_vm6 = vcmp.eq.s32.totalorder %v2361_v7, %v2346_v2  ;;  %v378_v23 = vadd.s32 4294967295, %v2361_v7  ;;  %s1618_s10 = sld [smem:[#allocation9 + $0x4]] }
  0x93   : > { %v432_v16 = vmul.f32 %v2351_v3, %v430_v12  ;;  %v436_v17 = vstv %s2342_s20  ;;  %v431_v18 = vmul.f32 %v2358_v6, %v430_v12  ;;  %1712 = vmatprep.mubr.msk.f32.mxu0 %vm463_vm0, %v2377_v14  ;;  %vm398_vm7 = vmand %vm395_vm4, %vm396_vm1  ;;  %vm412_vm9 = vcmp.eq.s32.totalorder %v2344_v1, %v411_v11  ;;  %s1619_s14 = sld [smem:[#allocation9 + $0x5]] }
  0x94   : > { %v438_v19 = vmul.f32 %v2367_v8, %v436_v17  ;;  %v437_v20 = vmul.f32 %v2371_v10, %v436_v17  ;;  %vm406_vm8 = vmand %vm404_vm6, %vm396_vm1  ;;  %v2401_v24 = vsel %vm398_vm7, 1.0, %v2095_v13  ;;  %vm413_vm10 = vcmp.eq.s32.totalorder %v2361_v7, %v411_v11  ;;  %s1609_s23 = sld [smem:[#allocation7 + $0x1]] }
  0x95   : > { %v434_v21 = vadd.f32 %v432_v16, %v427_v9  ;;  %v433_v22 = vadd.f32 %v431_v18, %v427_v9  ;;  %v546_v25 = vstv %s2348_s22  ;;  %v2407_v28 = vsel %vm406_vm8, 1.0, %v2095_v13  ;;  %vm2411_vm11 = vmand %vm412_vm9, %vm396_vm1  ;;  %s1608_s17 = sld [smem:[#allocation8 + $0x1]] }
  0x96   : > { %vm415_vm12 = vmand %vm413_vm10, %vm396_vm1  ;;  %v548_v30 = vmul.f32 %v2401_v24, %v546_v25  ;;  %v550_v31 = vstv %s2355_s19  ;;  %v556_v32 = vstv %s2364_s16  ;;  %vm380_vm13 = vcmp.eq.s32.totalorder %v2346_v2, %v378_v23  ;;  %s1610_s18 = sld [smem:[#allocation7 + $0x81]] }
  0x97   : > { %v440_v26 = vadd.f32 %v438_v19, %v434_v21  ;;  %v439_v27 = vadd.f32 %v437_v20, %v433_v22  ;;  %v2426_v35 = vsel %vm415_vm12, 1.0, %v2095_v13  ;;  %v552_v36 = vmul.f32 %v2407_v28, %v550_v31  ;;  %s1624_s9 = sld [smem:[#allocation9 + $0x6]] }
  0x98   : > { %v558_v37 = vmul.f32 %v2426_v35, %v556_v32  ;;  %v2433_v38 = vsel %vm380_vm13, 1.0, %v2095_v13  ;;  %v2448_v41 = vsel %vm2382_vm5, 1.0, %v2095_v13  ;;  %v2451_v42 = vsel %vm405_vm15, 1.0, %v2095_v13  ;;  %s1625_s30 = sld [smem:[#allocation9 + $0x7]] }
  0x99   : > { %v2420_v33 = vmax.f32 %v440_v26, 0.0  ;;  %v2422_v34 = vmax.f32 %v439_v27, 0.0  ;;  %v554_v39 = vadd.f32 %v552_v36, %v548_v30  ;;  %v2456_v43 = vsel %vm2411_vm11, 1.0, %v2095_v13  ;;  %s1626_s20 = sld [smem:[#allocation9 + $0x8]] }
  0x9a   : > { %v547_v44 = vmul.f32 %v2448_v41, %v546_v25  ;;  %v551_v45 = vmul.f32 %v2451_v42, %v550_v31  ;;  %v645_v46 = vstv %s1617_s29  ;;  %v557_v47 = vmul.f32 %v2456_v43, %v556_v32  ;;  %s1632_s22 = sld [smem:[#allocation9 + $0x80]] }
  0x9b   : > { %1708 = vmatprep.subr.mxu0 %v2420_v33  ;;  %v560_v40 = vadd.f32 %v558_v37, %v554_v39  ;;  %v647_v48 = vmul.f32 %v2401_v24, %v645_v46  ;;  %v649_v49 = vstv %s1618_s10  ;;  %v655_v51 = vstv %s1619_s14  ;;  %s1633_s19 = sld [smem:[#allocation9 + $0x81]] }
  0x9c   : > { %1709 = vmatpush3.msra.mxu0 %v2420_v33  ;;  %v651_v50 = vmul.f32 %v2407_v28, %v649_v49  ;;  %v553_v52 = vadd.f32 %v551_v45, %v547_v44  ;;  %v657_v53 = vmul.f32 %v2426_v35, %v655_v51  ;;  %v646_v54 = vmul.f32 %v2448_v41, %v645_v46  ;;  %s1634_s16 = sld [smem:[#allocation9 + $0x82]] }
  0x9d   : > { %1710 = vmatprep.subr.mxu0 %v2422_v34  ;;  %1715 = vmatprep.subr.mxu1 %v560_v40  ;;  %v650_v55 = vmul.f32 %v2451_v42, %v649_v49  ;;  %v656_v59 = vmul.f32 %v2456_v43, %v655_v51  ;;  %v447_v62 = vstv %s1609_s23  ;;  %v444_v0 = vstv %s1608_s17  ;;  %s2508_s29 = sld [smem:[#allocation9 + $0x83]] }
  0x9e   : > { %1711 = vmatpush3.msra.mxu0 %v2422_v34  ;;  %1716 = vmatpush3.msra.mxu1 %v560_v40  ;;  %v653_v56 = vadd.f32 %v651_v50, %v647_v48  ;;  %v559_v57 = vadd.f32 %v557_v47, %v553_v52  ;;  %v449_v63 = vmul.f32 %v2351_v3, %v447_v62  ;;  %v453_v4 = vstv %s1610_s18  ;;  %s2511_s10 = sld [smem:[#allocation9 + $0x84]] }
  0x9f   : > { %1713 = vmatmul.mubr.msk.f32.vlgmr.msra.gmra.mxu0 %vm463_vm0, %v2433_v38  ;;  %v652_v58 = vadd.f32 %v650_v55, %v646_v54  ;;  %v448_v5 = vmul.f32 %v2358_v6, %v447_v62  ;;  %v385_v9 = vadd.s32 1, %v2344_v1  ;;  %v455_v12 = vmul.f32 %v2367_v8, %v453_v4  ;;  %s2516_s14 = sld [smem:[#allocation9 + $0x85]] }
  0xa0   : > { %1726 = vmatprep.mubr.msk.f32.mxu0 %vm463_vm0, %v2422_v34  ;;  %v659_v60 = vadd.f32 %v657_v53, %v653_v56  ;;  %1717 = vmatprep.subr.mxu1 %v559_v57  ;;  %v451_v11 = vadd.f32 %v449_v63, %v444_v0  ;;  %v386_v15 = vadd.s32 1, %v2361_v7  ;;  %v454_v17 = vmul.f32 %v2371_v10, %v453_v4  ;;  %s1644_s23 = sld [smem:[#allocation9 + $0x86]] }
  0xa1   : > { %v658_v61 = vadd.f32 %v656_v59, %v652_v58  ;;  %1718 = vmatpush3.msra.mxu1 %v559_v57  ;;  %v450_v16 = vadd.f32 %v448_v5, %v444_v0  ;;  %vm387_vm1 = vcmp.eq.s32.totalorder %v2346_v2, %v385_v9  ;;  %v835_v21 = vstv %s1626_s20  ;;  %s1645_s17 = sld [smem:[#allocation9 + $0x87]] }
  0xa2   : > { %1722 = vmatprep.subr.mxu0 %v659_v60  ;;  %1729 = vmatprep.subr.mxu1 %v2420_v33  ;;  %v457_v19 = vadd.f32 %v455_v12, %v451_v11  ;;  %v2478_v3 = vsel %vm387_vm1, 1.0, %v2095_v13  ;;  %vm388_vm2 = vcmp.eq.s32.totalorder %v2346_v2, %v386_v15  ;;  %v825_v2 = vstv %s1624_s9  ;;  %s1646_s18 = sld [smem:[#allocation9 + $0x88]] }
  0xa3   : > { %1723 = vmatpush3.msra.mxu0 %v659_v60  ;;  %v456_v6 = vadd.f32 %v454_v17, %v450_v16  ;;  %v2489_v7 = vsel %vm388_vm2, 1.0, %v2095_v13  ;;  %v827_v10 = vmul.f32 %v2401_v24, %v825_v2  ;;  %v829_v13 = vstv %s1625_s30  ;;  %s460_s9 = sld [smem:[#allocation11]]  ;;  %s2561_s30 = scalar_lea.vmem [#allocation15], %s1585_s1 }
  0xa4   : > { %1724 = vmatprep.subr.mxu0 %v658_v61  ;;  %v2483_v1 = vmax.f32 %v457_v19, 0.0  ;;  %v837_v22 = vmul.f32 %v2426_v35, %v835_v21  ;;  %v826_v23 = vmul.f32 %v2448_v41, %v825_v2  ;;  %v830_v25 = vmul.f32 %v2451_v42, %v829_v13  ;;  %s1629_s20 = sld [smem:[#allocation11 + $0x1]] }
  0xa5   : > { %1725 = vmatpush3.msra.mxu0 %v658_v61  ;;  %v2492_v8 = vmax.f32 %v456_v6, 0.0  ;;  %v1002_v27 = vstv %s1632_s22  ;;  %v836_v30 = vmul.f32 %v2456_v43, %v835_v21  ;;  %v1006_v32 = vstv %s1633_s19  ;;  %s1376_s22 = sld [smem:[#allocation12]] }
  0xa6   : > { %1727 = vmatmul.mubr.msk.f32.vlgmr.msra.gmra.mxu0 %vm463_vm0, %v2420_v33  ;;  %v832_v29 = vadd.f32 %v830_v25, %v826_v23  ;;  %v1004_v31 = vmul.f32 %v2401_v24, %v1002_v27  ;;  %v1012_v36 = vstv %s1634_s16  ;;  %v1003_v39 = vmul.f32 %v2448_v41, %v1002_v27  ;;  %v1407_v27 = vld [vmem:[%s2318_s15] sm:$0xff]  ;;  %s1651_s19 = sld [smem:[#allocation12 + $0x1]] }
  0xa7   : > { %v1007_v40 = vmul.f32 %v2451_v42, %v1006_v32  ;;  %v1101_v45 = vstv %s2508_s29  ;;  %v1105_v46 = vstv %s2511_s10  ;;  %v1013_v48 = vmul.f32 %v2456_v43, %v1012_v36  ;;  %1409 = vst.msk [vmem:[%s2561_s30] sm:$0xff] %vm463_vm0, %v1407_v27  ;;  %s1373_s16 = sld [smem:[#allocation14]] }
  0xa8   : > { %v838_v37 = vadd.f32 %v836_v30, %v832_v29  ;;  %v1103_v49 = vmul.f32 %v2401_v24, %v1101_v45  ;;  %v1107_v50 = vmul.f32 %v2407_v28, %v1105_v46  ;;  %v1111_v52 = vstv %s2516_s14  ;;  %v1408_v29 = vld [vmem:[%s2318_s15 + $0x8] sm:$0xff]  ;;  %v1655_v30 = vld [vmem:[%s2318_s15 + $0x10] sm:$0xff]  ;;  %s1650_s29 = sld [smem:[#allocation14 + $0x1]]  ;;  %s1437_s14 = sshll.u32 %s2561_s30, 4  ;;  %s2582_s14 = int_to_ptr.vmem [resolvable:$true] %s1437_s14 }
  0xa9   : > { %v1009_v47 = vadd.f32 %v1007_v40, %v1003_v39  ;;  %v1102_v53 = vmul.f32 %v2448_v41, %v1101_v45  ;;  %v1106_v54 = vmul.f32 %v2451_v42, %v1105_v46  ;;  %v1113_v57 = vmul.f32 %v2426_v35, %v1111_v52  ;;  %1410 = vst.msk [vmem:[%s2561_s30 + $0x8] sm:$0xff] %vm463_vm0, %v1408_v29  ;;  %s2572_s1 = sld [smem:[#allocation12 + $0x80]] }
  0xaa   : > { %v1109_v56 = vadd.f32 %v1107_v50, %v1103_v49  ;;  %v1112_v58 = vmul.f32 %v2456_v43, %v1111_v52  ;;  %v1275_v11 = vstv %s1644_s23  ;;  %v1279_v15 = vstv %s1645_s17  ;;  %1657 = vst.msk [vmem:[%s2561_s30 + $0x20] sm:$0xff] %vm463_vm0, %v1655_v30  ;;  %s1652_s10 = sld [smem:[#allocation12 + $0x81]] }
  0xab   : > { %v1015_v55 = vadd.f32 %v1013_v48, %v1009_v47  ;;  %v1108_v59 = vadd.f32 %v1106_v54, %v1102_v53  ;;  %v1277_v12 = vmul.f32 %v2401_v24, %v1275_v11  ;;  %v1276_v16 = vmul.f32 %v2448_v41, %v1275_v11 }
  0xac   : > { %v1115_v60 = vadd.f32 %v1113_v57, %v1109_v56  ;;  %v1281_v17 = vmul.f32 %v2407_v28, %v1279_v15  ;;  %v1280_v19 = vmul.f32 %v2451_v42, %v1279_v15  ;;  %v461_v24 = vstv %s460_s9  ;;  %s2004_s9 = scalar_lea.vmem %s2582_s14, 1024 }
  0xad   : > { %v1114_v61 = vadd.f32 %v1112_v58, %v1108_v59  ;;  %p2005_p4 = scmp.ne.s32.totalorder %s2582_s14, %s2004_s9 }
  0xae   : > { %v1283_v6 = vadd.f32 %v1281_v17, %v1277_v12  ;;  %v1391_v45 = vstv %s1650_s29 }
  0xaf   : > { %p2006_p2 = pnand %p2005_p4, %p2666_p11 }
  0xb0   : > { %v1400_v52 = vstv %s1652_s10 }
  0xb1   : > { %p2007_p5 = pneg %p2006_p2 }
 0x15f   : > { %v1714_v18 = vpop.f32.mrf.mxu0 }
 0x161   : > { %v536_v20 = vpop.f32.mrf.mxu0 }
 0x162   : > { %1719 = vmatprep.mubr.msk.f32.mxu1 %vm463_vm0, %v536_v20 }
 0x163   : > { %1720 = vmatmul.mubr.msk.f32.vlgmr.msra.gmra.mxu1 %vm463_vm0, %v1714_v18  ;;  %v1285_v18 = vstv %s1646_s18 }
 0x164   : > { %1730 = vmatpush3.msra.mxu1 %v2420_v33  ;;  %1733 = vmatprep.mubr.msk.f32.mxu1 %vm463_vm0, %v2478_v3  ;;  %v1287_v20 = vmul.f32 %v2426_v35, %v1285_v18 }
 0x165   : > { %1731 = vmatprep.subr.mxu1 %v2422_v34 }
 0x166   : > { %1732 = vmatpush3.msra.mxu1 %v2422_v34  ;;  %v1008_v34 = vmul.f32 %v2407_v28, %v1006_v32  ;;  %v1728_v41 = vpop.f32.mrf.mxu0  ;;  %v924_v32 = vstv %s1629_s20  ;;  %s2096_s20 = smov [#allocation15]  }
 0x167   : > { %1743 = vmatprep.subr.mxu1 %v2483_v1  ;;  %1734 = vmatmul.mubr.msk.f32.vlgmr.msra.gmra.mxu1 %vm463_vm0, %v2489_v7 }
 0x168   : > { %1744 = vmatpush3.msra.mxu1 %v2483_v1  ;;  %1747 = vmatprep.mubr.msk.f32.mxu1 %vm463_vm0, %v2377_v14  ;;  %v831_v14 = vmul.f32 %v2407_v28, %v829_v13  ;;  %v1010_v44 = vadd.f32 %v1008_v34, %v1004_v31  ;;  %v732_v42 = vpop.f32.mrf.mxu0  ;;  %v1656_v31 = vld [vmem:[%s2318_s15 + $0x18] sm:$0xff]  ;;  %v1377_v34 = vstv %s1376_s22  ;;  %s1667_s15 = sshll.u32 %s2163_s8, 10  ;;  %s1424_s8 = scalar_lea.sflag [#allocation4], %s2312_s12 }
 0x169   : > { %1745 = vmatprep.subr.mxu1 %v2492_v8  ;;  %1658 = vst.msk [vmem:[%s2561_s30 + $0x28] sm:$0xff] %vm463_vm0, %v1656_v31  ;;  %s2580_s18 = scalar_lea.hbm %s2636_s7, %s1667_s15  ;;  %s2008_s22 = sshll.u32 %s2096_s20, 4  ;;  %s2009_s22 = int_to_ptr.vmem [resolvable:$false] %s2008_s22 }
 0x16a   : > { %1746 = vmatpush3.msra.mxu1 %v2492_v8  ;;  %v833_v26 = vadd.f32 %v831_v14, %v827_v10  ;;  %p2011_p8 = scmp.lt.s32.totalorder %s2582_s14, %s2009_s22 }
 0x16b   : > { %1748 = vmatmul.mubr.msk.f32.vlgmr.msra.gmra.mxu1 %vm463_vm0, %v2433_v38  ;;  %v1014_v38 = vmul.f32 %v2426_v35, %v1012_v36  ;;  %1757 = vmatprep.subr.mxu1 %v1115_v60 }
 0x16c   : > { %1761 = vmatprep.mubr.msk.f32.mxu1 %vm463_vm0, %v2492_v8  ;;  %v839_v33 = vadd.f32 %v837_v22, %v833_v26  ;;  %1758 = vmatpush3.msra.mxu1 %v1115_v60 }
 0x16d   : > { %v1016_v51 = vadd.f32 %v1014_v38, %v1010_v44  ;;  %1759 = vmatprep.subr.mxu1 %v1114_v61  ;;  %v1374_v44 = vstv %s1373_s16 }
 0x16e   : > { %1736 = vmatprep.subr.mxu0 %v839_v33  ;;  %1760 = vmatpush3.msra.mxu1 %v1114_v61 }
 0x16f   : > { %1737 = vmatpush3.msra.mxu0 %v839_v33  ;;  %1762 = vmatmul.mubr.msk.f32.vlgmr.msra.gmra.mxu1 %vm463_vm0, %v2483_v1 }
 0x170   : > { %1738 = vmatprep.subr.mxu0 %v838_v37 }
 0x171   : > { %1739 = vmatpush3.msra.mxu0 %v838_v37  ;;  %v1394_v37 = vstv %s1651_s19  ;;  %s2010_s19 = scalar_lea.vmem %s2009_s22, 2048 }
 0x172   : > { %1750 = vmatprep.subr.mxu0 %v1016_v51  ;;  %p2012_p6 = scmp.lt.s32.totalorder %s2010_s19, %s2004_s9 }
 0x174   : > { %p2013_p12 = por %p2012_p6, %p2011_p8 }
 0x176   : > { %p2014_p13 = pnand %p2013_p12, %p2007_p5 }
 0x223   : > { %v1721_v62 = vpop.f32.mrf.mxu1 }
 0x224   : > { %v643_v28 = vadd.f32 %v1721_v62, %v461_v24 }
 0x225   : > { %v633_v63 = vpop.f32.mrf.mxu1 }
 0x226   : > { %v642_v2 = vadd.f32 %v633_v63, %v461_v24  ;;  %v742_v35 = vadd.f32 %v1728_v41, %v643_v28 }
 0x227   : > { %v1735_v0 = vpop.f32.mrf.mxu1 }
 0x228   : > { %v741_v10 = vadd.f32 %v732_v42, %v642_v2 }
 0x229   : > { %v815_v4 = vpop.f32.mrf.mxu1 }
 0x22a   : > { %1740 = vmatprep.mubr.msk.f32.mxu0 %vm463_vm0, %v815_v4 }
 0x22b   : > { %1741 = vmatmul.mubr.msk.f32.vlgmr.msra.gmra.mxu0 %vm463_vm0, %v1735_v0  ;;  %v1749_v5 = vpop.f32.mrf.mxu1 }
 0x22c   : > { %1751 = vmatpush3.msra.mxu0 %v1016_v51  ;;  %v1383_v51 = vstv %s2572_s1 }
 0x22d   : > { %1752 = vmatprep.subr.mxu0 %v1015_v55  ;;  %v992_v9 = vpop.f32.mrf.mxu1 }
 0x22e   : > { %1753 = vmatpush3.msra.mxu0 %v1015_v55  ;;  %1754 = vmatprep.mubr.msk.f32.mxu0 %vm463_vm0, %v992_v9 }
 0x22f   : > { %1764 = vmatprep.subr.mxu0 %v2483_v1  ;;  %1755 = vmatmul.mubr.msk.f32.vlgmr.msra.gmra.mxu0 %vm463_vm0, %v1749_v5  ;;  %v1763_v33 = vpop.f32.mrf.mxu1 }
 0x230   : > { %1765 = vmatpush3.msra.mxu0 %v2483_v1  ;;  %1768 = vmatprep.mubr.msk.f32.mxu0 %vm463_vm0, %v2478_v3  ;;  %v1286_v3 = vmul.f32 %v2456_v43, %v1285_v18  ;;  %v1282_v1 = vadd.f32 %v1280_v19, %v1276_v16 }
 0x231   : > { %1766 = vmatprep.subr.mxu0 %v2492_v8  ;;  %v1188_v40 = vpop.f32.mrf.mxu1 }
 0x232   : > { %1767 = vmatpush3.msra.mxu0 %v2492_v8  ;;  %v1288_v8 = vadd.f32 %v1286_v3, %v1282_v1 }
 0x233   : > { %1769 = vmatmul.mubr.msk.f32.vlgmr.msra.gmra.mxu0 %vm463_vm0, %v2489_v7  ;;  %v1289_v7 = vadd.f32 %v1287_v20, %v1283_v6 }
 0x235   : > { %1771 = vmatprep.subr.mxu1 %v1289_v7 }
 0x236   : > { %1772 = vmatpush3.msra.mxu1 %v1289_v7 }
 0x237   : > { %1773 = vmatprep.subr.mxu1 %v1288_v8 }
 0x238   : > { %1774 = vmatpush3.msra.mxu1 %v1288_v8 }
 0x2eb   : > { %v1742_v43 = vpop.f32.mrf.mxu0 }
 0x2ec   : > { %v922_v13 = vadd.f32 %v1742_v43, %v742_v35 }
 0x2ed   : > { %v912_v14 = vpop.f32.mrf.mxu0 }
 0x2ee   : > { %v921_v21 = vadd.f32 %v912_v14, %v741_v10  ;;  %v1379_v39 = vmul.f32 %v1377_v34, %v922_v13  ;;  %v1396_v46 = vmul.f32 %v1394_v37, %v922_v13 }
 0x2ef   : > { %v1756_v22 = vpop.f32.mrf.mxu0 }
 0x2f0   : > { %v1099_v36 = vadd.f32 %v1756_v22, %v924_v32  ;;  %v1378_v48 = vmul.f32 %v1377_v34, %v921_v21  ;;  %v1395_v49 = vmul.f32 %v1394_v37, %v921_v21  ;;  %v1381_v55 = vadd.f32 %v1379_v39, %v1374_v44 }
 0x2f1   : > { %v1089_v23 = vpop.f32.mrf.mxu0  ;;  %v1398_v57 = vadd.f32 %v1396_v46, %v1391_v45 }
 0x2f2   : > { %v1098_v38 = vadd.f32 %v1089_v23, %v924_v32  ;;  %v1198_v47 = vadd.f32 %v1763_v33, %v1099_v36  ;;  %v1380_v61 = vadd.f32 %v1378_v48, %v1374_v44  ;;  %v1397_v62 = vadd.f32 %v1395_v49, %v1391_v45 }
 0x2f3   : > { %v1770_v25 = vpop.f32.mrf.mxu0 }
 0x2f4   : > { %v1197_v53 = vadd.f32 %v1188_v40, %v1098_v38 }
 0x2f5   : > { %v1265_v26 = vpop.f32.mrf.mxu0 }
 0x2f6   : > { %1775 = vmatprep.mubr.msk.f32.mxu1 %vm463_vm0, %v1265_v26 }
 0x2f7   : > { %1776 = vmatmul.mubr.msk.f32.vlgmr.msra.gmra.mxu1 %vm463_vm0, %v1770_v25 }
 0x3b7   : > { %v1777_v50 = vpop.f32.mrf.mxu1 }
 0x3b8   : > { %v1372_v54 = vadd.f32 %v1777_v50, %v1198_v47 }
 0x3b9   : > { %v1362_v56 = vpop.f32.mrf.mxu1 }
 0x3ba   : > { %v1385_v58 = vmul.f32 %v1383_v51, %v1372_v54  ;;  %v1402_v59 = vmul.f32 %v1400_v52, %v1372_v54  ;;  %v1371_v60 = vadd.f32 %v1362_v56, %v1197_v53 }
 0x3bc   : > { %v1387_v63 = vadd.f32 %v1385_v58, %v1381_v55  ;;  %v1404_v0 = vadd.f32 %v1402_v59, %v1398_v57  ;;  %v1384_v4 = vmul.f32 %v1383_v51, %v1371_v60  ;;  %v1401_v5 = vmul.f32 %v1400_v52, %v1371_v60 }
 0x3be   : > { %v1389_v9 = vmax.f32 %v1387_v63, 0.0  ;;  %v1406_v11 = vmax.f32 %v1404_v0, 0.0  ;;  %v1386_v12 = vadd.f32 %v1384_v4, %v1380_v61  ;;  %v1403_v15 = vadd.f32 %v1401_v5, %v1397_v62 }
 0x3c0   : > { %1654 = vst [vmem:[%s2561_s30 + $0x18] sm:$0xff] %v1389_v9  ;;  %1660 = vst [vmem:[%s2561_s30 + $0x38] sm:$0xff] %v1406_v11  ;;  %v1388_v16 = vmax.f32 %v1386_v12, 0.0  ;;  %v1405_v17 = vmax.f32 %v1403_v15, 0.0 }
 0x3c2   : > { %1653 = vst [vmem:[%s2561_s30 + $0x10] sm:$0xff] %v1388_v16  ;;  %1659 = vst [vmem:[%s2561_s30 + $0x30] sm:$0xff] %v1405_v17 }
 0x3c3   : > { %2017 = shalt.err (!%p2014_p13)
}
 0x3c4   : > { %s2018_s30 = scalar_lea.hbm %s2580_s18, 1024  ;;  %s2022_s1 = scalar_lea.hbm %s2636_s7, 2048 }
 0x3c5   : > { %p2019_p0 = scmp.ne.s32.totalorder %s2580_s18, %s2018_s30  ;;  %p2023_p10 = scmp.lt.s32.totalorder %s2580_s18, %s2636_s7 }
 0x3c6   : > { %p2024_p1 = scmp.lt.s32.totalorder %s2022_s1, %s2018_s30 }
 0x3c7   : > { %p2020_p7 = pnand %p2019_p0, %p2666_p11 }
 0x3c8   : > { %p2025_p3 = por %p2024_p1, %p2023_p10 }
 0x3c9   : > { %p2021_p9 = pneg %p2020_p7 }
 0x3cb   : > { %p2026_p4 = pnand %p2025_p3, %p2021_p9 }
 0x3cd   : > { %2029 = shalt.err (!%p2026_p4)
}
 0x3ce   : > { %s2097_s23 = smov 128   ;;  %s2098_s17 = smov 8  }
 0x3cf   : > { %1804 = dma.vmem_to_hbm [thread:$0]  (%p2666_p11), %s2582_s14, 1024, %s2580_s18, %s1424_s8, %s2097_s23, %s2097_s23, %s2098_s17  }
 0x3d0 PF: > { %s1452_s9 = sand.u32 1, %s2072_s24   ;;  %p2667_p2 = scmp.ne.s32.totalorder %s2650_s13, 0 }
 0x3d1   : > { %p2668_p5 = scmp.ge.s32.totalorder %s2084_s27, 2  ;;  %s1453_s20 = scalar_lea.sflag [#allocation4], %s1452_s9 }
 0x3d3   : > { %p1830_p8 = pnand %p2668_p5, %p2667_p2 }
 0x3d5   : > { %p1831_p6 = pneg %p1830_p8 }
 0x3d7   : > { %2067 = dma.done.wait (%p1831_p6), %s1453_s20, 1024  }
 0x3d8   : > { %2069 = vsyncadd (%p1831_p6), %s1453_s20, 4294966272  ;;  %p24_p12 = scmp.ge.s32.totalorder %s2240_s21, 4   ;;  %s2669_s24 = smov %s2076_s25 }
 0x3d9   : > { %s2670_s25 = smov %s2080_s26  ;;  %s2671_s26 = smov %s2251_s28 }
 0x3da   : > { %s2672_s27 = smov %s2240_s21  ;;  %26 = sbr.rel (!%p24_p12) target bundleno = 11 (0xb), region = 125 }
 0x3df   :  { %1458 = vsyncpa [#allocation3], 1 }
 0x3e0   :  { %1460 = vsyncpa [#allocation3 + $0x1], 1 }
 0x3e1   :  { %1461 = vsyncpa [#allocation4], 1 }
 0x3e2   :  { %1463 = vsyncpa [#allocation4 + $0x1], 1 }
 0x3e3   :  { %1464 = vsyncpa [#allocation5], 1 }
 0x3e4   :  { %1466 = vsyncpa [#allocation5 + $0x1], 1 }
 0x3e5   :  { %1467 = vsyncpa [#allocation6], 1 }
 0x3e6   :  { %1469 = vsyncpa [#allocation6 + $0x1], 1 }
 0x3e7   :  { %1470 = vsyncpa [#allocation10], 1 }
 0x3e8   :  { %1471 = vsyncpa [#allocation13], 1 }

</bundles_post_ra>
